<compile_context>
chip_gen: v7x
topology: tpu7x:2x2x1
jax: 0.10.0
libtpu: 0.0.40
codegen_flags: <defaults>
</compile_context>

<pallas_src>
import jax
import jax.numpy as jnp
from jax import lax
from jax.experimental import pallas as pl
from jax.experimental.pallas import tpu as pltpu

HIDDEN = 128


def _round_up(x, m):
    return ((x + m - 1) // m) * m


def _mlp_kernel(x_ref, w1_ref, b1_ref, w2_ref, b2_ref, w3_ref, b3_ref, o_ref):
    wdt = w1_ref.dtype  # matmul dtype (bf16 by default)
    # fc1 + ReLU : [tb, in] @ [in, 128] -> [tb, 128], f32 accumulate.
    h1 = jnp.dot(x_ref[...], w1_ref[...], preferred_element_type=jnp.float32)
    h1 = jnp.maximum(h1 + b1_ref[...], 0.0)
    # fc2 + ReLU : [tb, 128] @ [128, 128] -> [tb, 128].
    h2 = jnp.dot(h1.astype(wdt), w2_ref[...], preferred_element_type=jnp.float32)
    h2 = jnp.maximum(h2 + b2_ref[...], 0.0)
    # fc3, transposed: contract w3 [out,128] with h2 [tb,128] over the feature
    # axis -> [out, tb].  Lane-dense output store; batch sits on the MXU N dim.
    out_t = lax.dot_general(w3_ref[...], h2.astype(wdt),
                            (((1,), (1,)), ((), ())),
                            preferred_element_type=jnp.float32)
    o_ref[...] = (out_t + b3_ref[...]).astype(o_ref.dtype)


def value_net_forward(x, kparams, *, tb=2048):
    """x: [B, input_dim] (ideally already bf16; cast once here otherwise).
    kparams: layout-prepped params from prepare_params().
    Returns [B, output_dim] float32."""
    w1, b1 = kparams["w1"], kparams["b1"]
    w2, b2 = kparams["w2"], kparams["b2"]
    w3, b3 = kparams["w3"], kparams["b3"]

    B, in_dim = x.shape
    out_dim = w3.shape[0]  # w3 is [out_dim, 128]

    if x.dtype != w1.dtype:
        # Ideally the caller provides x already in the matmul dtype (bf16).
        x = x.astype(w1.dtype)

    # Batch tile selection:
    #  - small batches: one block equal to the full array (no (8,128) issues).
    #  - larger batches: tb multiple of 128 (lane-dense transposed output,
    #    (8,128) block rule), capped so the grid has >= 2 steps (v7x 2 TCs).
    if B <= 256:
        tb_eff = B
    else:
        tb_eff = min(tb, _round_up(pl.cdiv(B, 2), 128))
    grid = (pl.cdiv(B, tb_eff),)

    resident = lambda shape: pl.BlockSpec(shape, lambda i: (0, 0))

    out_t = pl.pallas_call(
        _mlp_kernel,
        out_shape=jax.ShapeDtypeStruct((out_dim, B), jnp.float32),
        grid_spec=pl.GridSpec(
            grid=grid,
            in_specs=[
                pl.BlockSpec((tb_eff, in_dim), lambda i: (i, 0)),   # x tiles
                resident(w1.shape), resident(b1.shape),
                resident(w2.shape), resident(b2.shape),
                resident(w3.shape), resident(b3.shape),
            ],
            # Transposed, lane-dense output: block walks the batch (lane) axis.
            out_specs=pl.BlockSpec((out_dim, tb_eff), lambda i: (0, i)),
        ),
        compiler_params=pltpu.CompilerParams(
            dimension_semantics=("parallel",),
        ),
    )(x, w1, b1, w2, b2, w3, b3)

    return out_t.T  # [B, out_dim] f32 (tiny transpose in the wrapper)


def init_params(key, input_dim, output_dim, hidden=HIDDEN):
    # PyTorch-style init/layout: Linear stores weight as [out, in], bias [out].
    ks = jax.random.split(key, 6)

    def lin(kw, kb, fan_in, fan_out):
        bound = 1.0 / jnp.sqrt(fan_in)
        w = jax.random.uniform(kw, (fan_out, fan_in), jnp.float32, -bound, bound)
        b = jax.random.uniform(kb, (fan_out,), jnp.float32, -bound, bound)
        return w, b

    w1, b1 = lin(ks[0], ks[1], input_dim, hidden)
    w2, b2 = lin(ks[2], ks[3], hidden, hidden)
    w3, b3 = lin(ks[4], ks[5], hidden, output_dim)
    return {"fc1_w": w1, "fc1_b": b1,
            "fc2_w": w2, "fc2_b": b2,
            "fc3_w": w3, "fc3_b": b3}


def prepare_params(params, dtype=jnp.bfloat16):
    """One-time layout prep (done once, not per forward call):
      w1, w2 -> [in, out] in matmul dtype; w3 kept [out, in] (native) for the
      transposed fc3; b1, b2 -> [1, out] f32; b3 -> [out, 1] f32."""
    return {
        "w1": params["fc1_w"].T.astype(dtype),
        "b1": params["fc1_b"][None, :].astype(jnp.float32),
        "w2": params["fc2_w"].T.astype(dtype),
        "b2": params["fc2_b"][None, :].astype(jnp.float32),
        "w3": params["fc3_w"].astype(dtype),
        "b3": params["fc3_b"][:, None].astype(jnp.float32),
    }


def _reference(x, p):
    h1 = jnp.maximum(x @ p["fc1_w"].T + p["fc1_b"], 0.0)
    h2 = jnp.maximum(h1 @ p["fc2_w"].T + p["fc2_b"], 0.0)
    return h2 @ p["fc3_w"].T + p["fc3_b"]


if __name__ == "__main__":
    key = jax.random.PRNGKey(0)
    kx, kx2, kx3, kp = jax.random.split(key, 4)

    input_dim, output_dim = 32, 8
    params = init_params(kp, input_dim, output_dim)
    kparams = prepare_params(params, dtype=jnp.bfloat16)

    # Small batch (single full-array block).
    x = jax.random.normal(kx, (8, input_dim), jnp.float32)
    out = jax.block_until_ready(value_net_forward(x.astype(jnp.bfloat16), kparams))
    ref = _reference(x, params)
    assert out.shape == (8, output_dim)
    assert jnp.allclose(out, ref, atol=5e-2, rtol=5e-2), \
        f"max err {jnp.max(jnp.abs(out - ref))}"

    # Odd batch (B=9): full-array block, no padding needed.
    x2 = jax.random.normal(kx2, (9, input_dim), jnp.float32)
    out2 = jax.block_until_ready(value_net_forward(x2.astype(jnp.bfloat16), kparams))
    ref2 = _reference(x2, params)
    assert out2.shape == (9, output_dim)
    assert jnp.allclose(out2, ref2, atol=5e-2, rtol=5e-2), \
        f"max err {jnp.max(jnp.abs(out2 - ref2))}"

    # Larger batch (B=300): 2 grid steps, ragged last block (no pad / no slice).
    x3 = jax.random.normal(kx3, (300, input_dim), jnp.float32)
    out3 = jax.block_until_ready(value_net_forward(x3.astype(jnp.bfloat16), kparams))
    ref3 = _reference(x3, params)
    assert out3.shape == (300, output_dim)
    assert jnp.allclose(out3, ref3, atol=5e-2, rtol=5e-2), \
        f"max err {jnp.max(jnp.abs(out3 - ref3))}"

    print("KERNEL_OK")
</pallas_src>

<mosaic_0001>
module attributes {stable_mosaic.version = 11 : i64} {
  func.func @_mlp_kernel(%arg0: i32, %arg1: memref<8x32xbf16, #tpu.memory_space<vmem>>, %arg2: memref<32x128xbf16, #tpu.memory_space<vmem>>, %arg3: memref<1x128xf32, #tpu.memory_space<vmem>>, %arg4: memref<128x128xbf16, #tpu.memory_space<vmem>>, %arg5: memref<1x128xf32, #tpu.memory_space<vmem>>, %arg6: memref<8x128xbf16, #tpu.memory_space<vmem>>, %arg7: memref<8x1xf32, #tpu.memory_space<vmem>>, %arg8: memref<8x8xf32, #tpu.memory_space<vmem>>) attributes {dimension_semantics = [#tpu.dimension_semantics<parallel>], iteration_bounds = array<i64: 1>, scalar_prefetch = 0 : i64, scratch_operands = 0 : i64, tpu.core_type = #tpu.core_type<tc>, window_params = [{transform_indices = @transform_0, window_bounds = array<i64: 8, 32>}, {pipeline_mode = #tpu.pipeline_mode<synchronous>, transform_indices = @transform_1, window_bounds = array<i64: 32, 128>}, {pipeline_mode = #tpu.pipeline_mode<synchronous>, transform_indices = @transform_2, window_bounds = array<i64: 1, 128>}, {pipeline_mode = #tpu.pipeline_mode<synchronous>, transform_indices = @transform_3, window_bounds = array<i64: 128, 128>}, {pipeline_mode = #tpu.pipeline_mode<synchronous>, transform_indices = @transform_4, window_bounds = array<i64: 1, 128>}, {pipeline_mode = #tpu.pipeline_mode<synchronous>, transform_indices = @transform_5, window_bounds = array<i64: 8, 128>}, {pipeline_mode = #tpu.pipeline_mode<synchronous>, transform_indices = @transform_6, window_bounds = array<i64: 8, 1>}, {transform_indices = @transform_7, window_bounds = array<i64: 8, 8>}]} {
    %c0 = arith.constant 0 : index
    %c0_0 = arith.constant 0 : index
    %0 = vector.load %arg1[%c0, %c0_0] : memref<8x32xbf16, #tpu.memory_space<vmem>>, vector<8x32xbf16>
    %c0_1 = arith.constant 0 : index
    %c0_2 = arith.constant 0 : index
    %1 = vector.load %arg2[%c0_1, %c0_2] : memref<32x128xbf16, #tpu.memory_space<vmem>>, vector<32x128xbf16>
    %cst = arith.constant dense<0.000000e+00> : vector<8x128xf32>
    %2 = tpu.matmul %0, %1, %cst {dimension_numbers = #tpu.dot_dimension_numbers<[1], [0], [0], [1], [0, 0, 1, 1], [], []>} : vector<8x32xbf16>, vector<32x128xbf16>, vector<8x128xf32> -> vector<8x128xf32>
    %c0_3 = arith.constant 0 : index
    %c0_4 = arith.constant 0 : index
    %3 = vector.load %arg3[%c0_3, %c0_4] : memref<1x128xf32, #tpu.memory_space<vmem>>, vector<1x128xf32>
    %4 = vector.broadcast %3 : vector<1x128xf32> to vector<8x128xf32>
    %5 = arith.addf %2, %4 : vector<8x128xf32>
    %cst_5 = arith.constant 0.000000e+00 : f32
    %6 = vector.broadcast %cst_5 : f32 to vector<8x128xf32>
    %7 = arith.maximumf %5, %6 : vector<8x128xf32>
    %8 = arith.truncf %7 : vector<8x128xf32> to vector<8x128xbf16>
    %c0_6 = arith.constant 0 : index
    %c0_7 = arith.constant 0 : index
    %9 = vector.load %arg4[%c0_6, %c0_7] : memref<128x128xbf16, #tpu.memory_space<vmem>>, vector<128x128xbf16>
    %cst_8 = arith.constant dense<0.000000e+00> : vector<8x128xf32>
    %10 = tpu.matmul %8, %9, %cst_8 {dimension_numbers = #tpu.dot_dimension_numbers<[1], [0], [0], [1], [0, 0, 1, 1], [], []>} : vector<8x128xbf16>, vector<128x128xbf16>, vector<8x128xf32> -> vector<8x128xf32>
    %c0_9 = arith.constant 0 : index
    %c0_10 = arith.constant 0 : index
    %11 = vector.load %arg5[%c0_9, %c0_10] : memref<1x128xf32, #tpu.memory_space<vmem>>, vector<1x128xf32>
    %12 = vector.broadcast %11 : vector<1x128xf32> to vector<8x128xf32>
    %13 = arith.addf %10, %12 : vector<8x128xf32>
    %cst_11 = arith.constant 0.000000e+00 : f32
    %14 = vector.broadcast %cst_11 : f32 to vector<8x128xf32>
    %15 = arith.maximumf %13, %14 : vector<8x128xf32>
    %c0_12 = arith.constant 0 : index
    %c0_13 = arith.constant 0 : index
    %16 = vector.load %arg6[%c0_12, %c0_13] : memref<8x128xbf16, #tpu.memory_space<vmem>>, vector<8x128xbf16>
    %17 = arith.truncf %15 : vector<8x128xf32> to vector<8x128xbf16>
    %cst_14 = arith.constant dense<0.000000e+00> : vector<8x8xf32>
    %18 = tpu.matmul %16, %17, %cst_14 {dimension_numbers = #tpu.dot_dimension_numbers<[1], [1], [0], [0], [0, 0, 1, 0], [], []>} : vector<8x128xbf16>, vector<8x128xbf16>, vector<8x8xf32> -> vector<8x8xf32>
    %c0_15 = arith.constant 0 : index
    %c0_16 = arith.constant 0 : index
    %19 = vector.load %arg7[%c0_15, %c0_16] : memref<8x1xf32, #tpu.memory_space<vmem>>, vector<8x1xf32>
    %20 = vector.broadcast %19 : vector<8x1xf32> to vector<8x8xf32>
    %21 = arith.addf %18, %20 : vector<8x8xf32>
    %c0_17 = arith.constant 0 : index
    %c0_18 = arith.constant 0 : index
    %22 = vector.load %arg8[%c0_17, %c0_18] : memref<8x8xf32, #tpu.memory_space<vmem>>, vector<8x8xf32>
    tpu.vector_store %arg8[%c0_17, %c0_18], %21 {strides = array<i32>} : memref<8x8xf32, #tpu.memory_space<vmem>>, vector<8x8xf32>,
    return
  }
  func.func @transform_0(%arg0: i32) -> (i32, i32) {
    %c0_i32 = arith.constant 0 : i32
    %c0_i32_0 = arith.constant 0 : i32
    return %arg0, %c0_i32 : i32, i32
  }
  func.func @transform_1(%arg0: i32) -> (i32, i32) {
    %c0_i32 = arith.constant 0 : i32
    %c0_i32_0 = arith.constant 0 : i32
    %c0_i32_1 = arith.constant 0 : i32
    return %c0_i32, %c0_i32_0 : i32, i32
  }
  func.func @transform_2(%arg0: i32) -> (i32, i32) {
    %c0_i32 = arith.constant 0 : i32
    %c0_i32_0 = arith.constant 0 : i32
    %c0_i32_1 = arith.constant 0 : i32
    return %c0_i32, %c0_i32_0 : i32, i32
  }
  func.func @transform_3(%arg0: i32) -> (i32, i32) {
    %c0_i32 = arith.constant 0 : i32
    %c0_i32_0 = arith.constant 0 : i32
    %c0_i32_1 = arith.constant 0 : i32
    return %c0_i32, %c0_i32_0 : i32, i32
  }
  func.func @transform_4(%arg0: i32) -> (i32, i32) {
    %c0_i32 = arith.constant 0 : i32
    %c0_i32_0 = arith.constant 0 : i32
    %c0_i32_1 = arith.constant 0 : i32
    return %c0_i32, %c0_i32_0 : i32, i32
  }
  func.func @transform_5(%arg0: i32) -> (i32, i32) {
    %c0_i32 = arith.constant 0 : i32
    %c0_i32_0 = arith.constant 0 : i32
    %c0_i32_1 = arith.constant 0 : i32
    return %c0_i32, %c0_i32_0 : i32, i32
  }
  func.func @transform_6(%arg0: i32) -> (i32, i32) {
    %c0_i32 = arith.constant 0 : i32
    %c0_i32_0 = arith.constant 0 : i32
    %c0_i32_1 = arith.constant 0 : i32
    return %c0_i32, %c0_i32_0 : i32, i32
  }
  func.func @transform_7(%arg0: i32) -> (i32, i32) {
    %c0_i32 = arith.constant 0 : i32
    %c0_i32_0 = arith.constant 0 : i32
    return %c0_i32, %arg0 : i32, i32
  }
}

</mosaic_0001>

<bundles_post_ra>
// kernel: tpu_custom_call.1
= control target key start
LH: loop header
LB: loop body
LE: loop exit
PB: predicated region body
PF: predicated region fallthrough
CT: control target
= control target key end

     0   :  { %12 = vsyncpa [#allocation3], 0  ;;  %s558_s0 = inlined_call_operand.vmem [shape: bf16[8,32], index: 0, kind: input, shape index: {}]   ;;  %s559_s1 = inlined_call_operand.hbm [shape: bf16[32,128], index: 1, kind: input, shape index: {}]   ;;  %s560_s2 = inlined_call_operand.vmem [shape: f32[1,128], index: 2, kind: input, shape index: {}]   ;;  %s561_s3 = inlined_call_operand.hbm [shape: bf16[128,128], index: 3, kind: input, shape index: {}]   ;;  %s562_s4 = inlined_call_operand.vmem [shape: f32[1,128], index: 4, kind: input, shape index: {}]   ;;  %s563_s5 = inlined_call_operand.vmem [shape: bf16[8,128], index: 5, kind: input, shape index: {}]   ;;  %s564_s6 = inlined_call_operand.vmem [shape: f32[8,1], index: 6, kind: input, shape index: {}]   ;;  %s565_s7 = inlined_call_operand.hbm [shape: f32[8,8], index: 7, kind: output, shape index: {}]  }
   0x1   :  { %13 = vsyncpa [#allocation6], 0 }
   0x2   :  { %14 = vsyncpa [#allocation4], 0  ;;  %s456_s24 = smov [#allocation2]   ;;  %s384_s28 = scalar_lea.hbm %s559_s1, 256 }
   0x3   :  { %s22_s25 = sshll.u32 %s456_s24, 4  ;;  %p385_p0 = scmp.ne.s32.totalorder %s559_s1, %s384_s28  ;;  %s23_s25 = int_to_ptr.vmem [resolvable:$true] %s22_s25 }
   0x4   :  { %p388_p1 = scmp.lt.u32.totalorder %s384_s28, %s559_s1 }
   0x6   :  { %p390_p2 = pnand %p388_p1, %p385_p0 }
   0x8   :  { %393 = shalt.err (!%p390_p2)
}
   0x9   :  { %s394_s10 = scalar_lea.vmem %s23_s25, 256  ;;  %p399_p4 = scmp.lt.s32.totalorder %s23_s25, %s23_s25 }
   0xa   :  { %p395_p3 = scmp.ne.s32.totalorder %s23_s25, %s394_s10  ;;  %p400_p5 = scmp.lt.s32.totalorder %s394_s10, %s394_s10 }
   0xc   :  { %p401_p6 = por %p400_p5, %p399_p4 }
   0xe   :  { %p402_p7 = pnand %p401_p6, %p395_p3 }
  0x10   :  { %405 = shalt.err (!%p402_p7)
}
  0x11   :  { %s457_s11 = smov 64   ;;  %s458_s12 = smov 4  }
  0x12   :  { %28 = dma.hbm_to_vmem [thread:$0]  %s559_s1, 256, %s23_s25, [#allocation3], %s457_s11, %s457_s11, %s458_s12  }
  0x13   :  { %s459_s15 = smov [#allocation5]   ;;  %s406_s19 = scalar_lea.hbm %s561_s3, 1024 }
  0x14   :  { %s36_s16 = sshll.u32 %s459_s15, 4  ;;  %p407_p8 = scmp.ne.s32.totalorder %s561_s3, %s406_s19  ;;  %s37_s16 = int_to_ptr.vmem [resolvable:$true] %s36_s16 }
  0x15   :  { %p410_p9 = scmp.lt.u32.totalorder %s406_s19, %s561_s3 }
  0x17   :  { %p412_p10 = pnand %p410_p9, %p407_p8 }
  0x19   :  { %415 = shalt.err (!%p412_p10)
}
  0x1a   :  { %s416_s24 = scalar_lea.vmem %s37_s16, 1024  ;;  %p421_p12 = scmp.lt.s32.totalorder %s37_s16, %s37_s16 }
  0x1b   :  { %p417_p11 = scmp.ne.s32.totalorder %s37_s16, %s416_s24  ;;  %p422_p13 = scmp.lt.s32.totalorder %s416_s24, %s416_s24 }
  0x1d   :  { %p423_p0 = por %p422_p13, %p421_p12 }
  0x1f   :  { %p424_p1 = pnand %p423_p0, %p417_p11 }
  0x21   :  { %427 = shalt.err (!%p424_p1)
}
  0x22   :  { %42 = dma.hbm_to_vmem [thread:$0]  %s561_s3, 1024, %s37_s16, [#allocation6], %s457_s11, %s457_s11, %s458_s12  }
  0x23   :  { %450 = dma.done.wait [#allocation3], 256  }
  0x24   :  { %451 = vsyncadd [#allocation3], 4294967040 }
  0x25   :  { %452 = dma.done.wait [#allocation6], 1024  }
  0x26   :  { %453 = vsyncadd [#allocation6], 4294966272  ;;  %v460_v0 = vmov 0.0   ;;  %vm461_vm0 = vmmov 0   ;;  %v374_v1 = vld [vmem:[#allocation2] sm:$0xff]   ;;  %v375_v2 = vld [vmem:[#allocation2 + $0x8] sm:$0xff]  }
  0x27   :  { %331 = vmatprep.subr.bf16.mxu0 %v460_v0  ;;  %335 = vmatprep.mubr.msk.bf16.mxu0 %vm461_vm0, %v460_v0  ;;  %v376_v3 = vld [vmem:[#allocation5] sm:$0xff]   ;;  %vm80_vm1 = vcmask 261120   ;;  %v377_v4 = vld [vmem:[#allocation5 + $0x8] sm:$0xff]   ;;  %v56_v5 = vld [vmem:[%s558_s0] sm:$0xf]  ;;  %v462_v21 = vmov 0  }
  0x28   :  { %339 = vmatprep.subr.bf16.mxu1 %v460_v0  ;;  %355 = vmatprep.mubr.msk.bf16.mxu1 %vm461_vm0, %v460_v0  ;;  %v378_v6 = vld [vmem:[#allocation5 + $0x10] sm:$0xff]   ;;  %v379_v7 = vld [vmem:[#allocation5 + $0x18] sm:$0xff]   ;;  %v380_v8 = vld [vmem:[#allocation5 + $0x20] sm:$0xff]   ;;  %vm286_vm2 = vcmask 64512  }
  0x29   :  { %332 = vmatpush3.bf16.msra.mxu0 %v374_v1  ;;  %340 = vmatpush3.bf16.msra.mxu1 %v376_v3  ;;  %v381_v9 = vld [vmem:[#allocation5 + $0x28] sm:$0xff]   ;;  %v382_v10 = vld [vmem:[#allocation5 + $0x30] sm:$0xff]   ;;  %v383_v11 = vld [vmem:[#allocation5 + $0x38] sm:$0xff]  }
  0x2a   :  { %333 = vmatprep.subr.bf16.mxu0 %v460_v0  ;;  %341 = vmatprep.subr.bf16.mxu1 %v460_v0  ;;  %v304_v12 = vld [vmem:[%s560_s2] ss:$0 sm:$0xff] }
  0x2b   :  { %v240_v20 = vld [vmem:[%s564_s6] sm:$0xff]  ;;  %373 = vset.pattern.permute.xlu0 %v462_v21  ;;  %s463_s6 = smov [#allocation7]  }
  0x2c   :  { %243 = vperm.xlu0 %373, %v240_v20   ;;  %v308_v22 = vld [vmem:[%s562_s4] ss:$0 sm:$0xff]  ;;  %s294_s10 = sshll.u32 %s463_s6, 4  ;;  %s295_s10 = int_to_ptr.vmem [resolvable:$true] %s294_s10 }
  0x2d   :  { %334 = vmatpush3.bf16.msra.mxu0 %v375_v2  ;;  %342 = vmatpush3.bf16.msra.mxu1 %v377_v4  ;;  %v238_v30 = vld [vmem:[%s563_s5] sm:$0xf]  ;;  %s428_s4 = scalar_lea.vmem %s295_s10, 128  ;;  %p433_p3 = scmp.lt.s32.totalorder %s295_s10, %s295_s10 }
  0x2e   :  { %359 = vmatprep.subr.bf16.mxu0 %v460_v0  ;;  %343 = vmatprep.subr.bf16.mxu1 %v460_v0  ;;  %p429_p2 = scmp.ne.s32.totalorder %s295_s10, %s428_s4  ;;  %p434_p4 = scmp.lt.s32.totalorder %s428_s4, %s428_s4 }
  0x30   :  { %336 = vmatmul.mubr.msk.bf16.vlgmr.msra.gmra.mrb[0].mxu0 %vm80_vm1, %v56_v5  ;;  %p435_p5 = por %p434_p4, %p433_p3 }
  0x31   :  { %361 = vmatprep.mubr.msk.bf16.mxu0 %vm461_vm0, %v460_v0  ;;  %344 = vmatpush3.bf16.msra.mxu1 %v378_v6 }
  0x32   :  { %345 = vmatprep.subr.bf16.mxu1 %v460_v0  ;;  %p436_p6 = pnand %p435_p5, %p429_p2 }
  0x35   :  { %346 = vmatpush3.bf16.msra.mxu1 %v379_v7 }
  0x36   :  { %347 = vmatprep.subr.bf16.mxu1 %v460_v0 }
  0x39   :  { %348 = vmatpush3.bf16.msra.mxu1 %v380_v8 }
  0x3a   :  { %349 = vmatprep.subr.bf16.mxu1 %v460_v0 }
  0x3d   :  { %350 = vmatpush3.bf16.msra.mxu1 %v381_v9 }
  0x3e   :  { %351 = vmatprep.subr.bf16.mxu1 %v460_v0 }
  0x41   :  { %352 = vmatpush3.bf16.msra.mxu1 %v382_v10 }
  0x42   :  { %353 = vmatprep.subr.bf16.mxu1 %v460_v0 }
  0x45   :  { %354 = vmatpush3.bf16.msra.mxu1 %v383_v11 }
  0xab   :  { %v244_v31 = vpop.permute.xlu0 %243 }
 0x103   :  { %v118_v13 = vpop.f32.mrb[0].mxu0 }
 0x104   :  { %v119_v14 = vadd.f32 %v304_v12, %v118_v13  ;;  %v337_v15 = vpop.f32.mrb[1].mxu0 }
 0x105   :  { %v121_v16 = vpop.f32.mrb[2].mxu0 }
 0x106   :  { %v124_v17 = vmax.f32 %v119_v14, 0.0  ;;  %v338_v18 = vpop.f32.mrb[3].mxu0 }
 0x108   :  { %v125_v19 = vpack.c.bf16 %v124_v17, %v124_v17 }
 0x10a   :  { %356 = vmatmul.mubr.bf16.vlgmr.msra.gmra.mrb[0].mxu1 %v125_v19 }
 0x1dd   :  { %v231_v23 = vpop.f32.mrb[0].mxu1 }
 0x1de   :  { %v232_v24 = vadd.f32 %v308_v22, %v231_v23  ;;  %v357_v25 = vpop.f32.mrb[1].mxu1 }
 0x1df   :  { %v234_v26 = vpop.f32.mrb[2].mxu1 }
 0x1e0   :  { %v237_v27 = vmax.f32 %v232_v24, 0.0  ;;  %v358_v28 = vpop.f32.mrb[3].mxu1 }
 0x1e2   :  { %v239_v29 = vpack.c.bf16 %v237_v27, %v237_v27 }
 0x1e4   :  { %360 = vmatpush3.bf16.xpose.msra.mxu0 %v239_v29 }
 0x1eb   :  { %362 = vmatmul.mubr.bf16.vlgmr.msra.gmra.mrb[4].mxu0 %v238_v30 }
 0x2be   :  { %v280_v32 = vpop.f32.mrb[4].mxu0 }
 0x2bf   :  { %v281_v33 = vadd.f32 %v280_v32, %v244_v31  ;;  %v363_v34 = vpop.f32.mrb[5].mxu0 }
 0x2c0   :  { %v283_v35 = vpop.f32.mrb[6].mxu0 }
 0x2c1   :  { %v364_v36 = vpop.f32.mrb[7].mxu0  ;;  %287 = vst.msk [vmem:[#allocation7] sm:$0xff] %vm286_vm2, %v281_v33 }
 0x2c2   :  { %439 = shalt.err (!%p436_p6)
}
 0x2c3   :  { %s440_s12 = scalar_lea.hbm %s565_s7, 128 }
 0x2c4   :  { %p441_p7 = scmp.ne.s32.totalorder %s565_s7, %s440_s12  ;;  %p444_p8 = scmp.lt.u32.totalorder %s440_s12, %s565_s7 }
 0x2c6   :  { %p446_p9 = pnand %p444_p8, %p441_p7 }
 0x2c8   :  { %449 = shalt.err (!%p446_p9)
}
 0x2c9   :  { %297 = dma.vmem_to_hbm [thread:$0]  %s295_s10, 128, %s565_s7, [#allocation4]  }
 0x2ca   :  { %454 = dma.done.wait [#allocation4], 128  }
 0x2cb   :  { %455 = vsyncadd [#allocation4], 4294967168 }
 0x2cc   :  { %301 = vsyncpa [#allocation3], 1 }
 0x2cd   :  { %302 = vsyncpa [#allocation6], 1 }
 0x2ce   :  { %303 = vsyncpa [#allocation4], 1 }

</bundles_post_ra>
